<compile_context>
chip_gen: v5e
topology: v5e:2x2
jax: 0.10.0
libtpu: 0.0.40
codegen_flags: <defaults>
</compile_context>

<pallas_src>
import jax
import jax.numpy as jnp
from jax.experimental import pallas as pl
from jax.experimental.pallas import tpu as pltpu


def _time_decay_kernel(h_ref, scale_ref, out_ref, acc_ref):
    # h_ref:     (TS, TB, NH)  step-tile of hidden states (native S-major layout)
    # scale_ref: (S, TB, 1)    full / resident: rnn_index * (tii @ time_weight)
    # out_ref:   (TB, NH)      weighted step-sum (node sum done in XLA epilogue)
    # acc_ref:   (TB, NH) f32  VMEM accumulator across the S reduction grid axis
    s = pl.program_id(1)
    ts = h_ref.shape[0]

    @pl.when(s == 0)
    def _init():
        acc_ref[...] = jnp.zeros_like(acc_ref)

    s0 = pl.multiple_of(s * ts, ts)
    sc = scale_ref[pl.ds(s0, ts), :, :]              # (TS, TB, 1) f32
    h = h_ref[...].astype(jnp.float32)               # (TS, TB, NH)
    acc_ref[...] += jnp.sum(h * sc, axis=0)          # VPU mul-add; no MXU (M==1)

    @pl.when(s == pl.num_programs(1) - 1)
    def _finalize():
        out_ref[...] = acc_ref[...].astype(out_ref.dtype)


def _largest_divisor_leq(n, cap):
    cap = max(1, min(n, cap))
    for d in range(cap, 0, -1):
        if n % d == 0:
            return d
    return 1


def time_decay_forward(last_h, n_step, hidden_dim, rnn_index,
                       time_interval_index, time_weight,
                       num_layers, n_time_interval):
    # The PyTorch loop body reassigns `last_h`; only num_layers == 1 is meaningful.
    assert num_layers == 1
    h = last_h[0]                                    # (S, B, N, H) native layout
    S, B, N, H = h.shape
    assert S == n_step and H == hidden_dim[0]
    NH = N * H

    # Lane-dense view of the big tensor: contiguous reshape, no HBM transpose.
    h2 = h.reshape(S, B, NH)

    # Tiny XLA pre-pass (O(B*S*T) flops): per-(b, s) scalar scale.
    rnn = rnn_index.reshape(B, S).astype(jnp.float32)
    decay = (time_interval_index.reshape(B * S, n_time_interval).astype(jnp.float32)
             @ time_weight.reshape(n_time_interval, 1).astype(jnp.float32)
             ).reshape(B, S)
    scale = (rnn * decay).T.reshape(S, B, 1)         # (S, B, 1), matches h layout

    # Step-tile: keep the h tile well under ~2 MiB so double-buffering stays far
    # below even v7x's default scoped VMEM limit, and force >= 2 tiles along S
    # when possible so the HBM->VMEM DMA pipelines against compute.
    itemsize = jnp.dtype(h2.dtype).itemsize
    bytes_per_step = B * NH * itemsize
    budget_steps = max(1, (2 * 1024 * 1024) // max(1, bytes_per_step))
    cap = min(budget_steps, S // 2) if S > 1 else 1
    ts = _largest_divisor_leq(S, cap)

    # TB = B here (B is tiny and must equal the full dim or be an 8-multiple);
    # for large batches this would become an 8-multiple tile sharded "parallel".
    tb = B
    grid = (B // tb, S // ts)

    flops = 2 * B * S * NH
    bytes_accessed = S * B * NH * itemsize + S * B * 4 + B * NH * 4

    out2 = pl.pallas_call(
        _time_decay_kernel,
        out_shape=jax.ShapeDtypeStruct((B, NH), jnp.float32),
        grid_spec=pltpu.PrefetchScalarGridSpec(
            num_scalar_prefetch=0,
            grid=grid,
            in_specs=[
                # permute(1, 0, 2, 3) expressed purely via the index_map swap.
                pl.BlockSpec((ts, tb, NH), lambda b, s: (s, b, 0)),
                pl.BlockSpec((S, tb, 1), lambda b, s: (0, b, 0)),
            ],
            out_specs=pl.BlockSpec((tb, NH), lambda b, s: (b, 0)),
            scratch_shapes=[pltpu.VMEM((tb, NH), jnp.float32)],
        ),
        compiler_params=pltpu.CompilerParams(
            dimension_semantics=("parallel", "arbitrary")),
        cost_estimate=pl.CostEstimate(flops=flops, transcendentals=0,
                                      bytes_accessed=bytes_accessed),
    )(h2, scale)

    # Tiny XLA epilogue: node reduction (B, N, H) -> (B, H) on the small result.
    return out2.reshape(B, N, H).sum(axis=1)


if __name__ == "__main__":
    key = jax.random.PRNGKey(0)
    num_layers = 1
    n_time_interval = 6
    B, S, N, H = 2, 8, 16, 32       # batch, n_step, n_nodes, hidden
    hidden_dim = [H]

    k1, k2, k3, k4 = jax.random.split(key, 4)
    last_h = jax.random.normal(k1, (num_layers, S, B, N, H), dtype=jnp.float32)
    rnn_index = (jax.random.uniform(k2, (B, S)) > 0.3).astype(jnp.float32)
    interval_ids = jax.random.randint(k3, (B, S), 0, n_time_interval)
    time_interval_index = jax.nn.one_hot(interval_ids, n_time_interval,
                                         dtype=jnp.float32)

    # Deterministic xavier_normal_ init for time_weight (shape (T, 1)):
    # std = sqrt(2 / (fan_in + fan_out)) = sqrt(2 / (T + 1))
    std = (2.0 / (n_time_interval + 1)) ** 0.5
    time_weight = std * jax.random.normal(k4, (n_time_interval, 1),
                                          dtype=jnp.float32)

    out = time_decay_forward(last_h, S, hidden_dim, rnn_index,
                             time_interval_index, time_weight,
                             num_layers, n_time_interval)
    out = jax.block_until_ready(out)

    # Pure-JAX reference (mirrors the PyTorch forward exactly).
    h_ref = jnp.transpose(last_h[0], (1, 0, 2, 3))
    h_sum = jnp.sum(h_ref, axis=2).reshape(-1, H)
    r = rnn_index.reshape(-1, 1)
    tii_flat = time_interval_index.reshape(-1, n_time_interval)
    decay = tii_flat @ time_weight
    ref = jnp.sum((decay * (r * h_sum)).reshape(-1, S, H), axis=1)

    assert out.shape == (B, H)
    assert jnp.allclose(out, ref, atol=1e-4, rtol=1e-4)
    print("KERNEL_OK")
</pallas_src>

<mosaic_0001>
module attributes {stable_mosaic.version = 11 : i64} {
  func.func @_time_decay_kernel(%arg0: i32, %arg1: i32, %arg2: memref<4x2x512xf32, #tpu.memory_space<vmem>>, %arg3: memref<8x2x1xf32, #tpu.memory_space<vmem>>, %arg4: memref<2x512xf32, #tpu.memory_space<vmem>>, %arg5: memref<2x512xf32, #tpu.memory_space<vmem>>) attributes {dimension_semantics = [#tpu.dimension_semantics<parallel>, #tpu.dimension_semantics<arbitrary>], iteration_bounds = array<i64: 1, 2>, scalar_prefetch = 0 : i64, scratch_operands = 1 : i64, tpu.core_type = #tpu.core_type<tc>, window_params = [{transform_indices = @transform_0, window_bounds = array<i64: 4, 2, 512>}, {transform_indices = @transform_1, window_bounds = array<i64: 8, 2, 1>}, {transform_indices = @transform_2, window_bounds = array<i64: 2, 512>}]} {
    %c0_i32 = arith.constant 0 : i32
    %0 = arith.cmpi eq, %arg1, %c0_i32 : i32
    %1 = arith.extui %0 : i1 to i32
    %c0_i32_0 = arith.constant 0 : i32
    %2 = arith.cmpi ne, %1, %c0_i32_0 : i32
    scf.if %2 {
      %cst_10 = arith.constant 0.000000e+00 : f32
      %17 = vector.broadcast %cst_10 : f32 to vector<2x512xf32>
      %c0_11 = arith.constant 0 : index
      %c0_12 = arith.constant 0 : index
      %18 = vector.load %arg5[%c0_11, %c0_12] : memref<2x512xf32, #tpu.memory_space<vmem>>, vector<2x512xf32>
      tpu.vector_store %arg5[%c0_11, %c0_12], %17 {strides = array<i32>} : memref<2x512xf32, #tpu.memory_space<vmem>>, vector<2x512xf32>,
    } else {
    }
    %c4_i32 = arith.constant 4 : i32
    %3 = arith.muli %arg1, %c4_i32 : i32
    %4 = tpu.assume_multiple %3, 4 : i32
    %5 = arith.index_cast %4 : i32 to index
    %c0 = arith.constant 0 : index
    %c0_1 = arith.constant 0 : index
    %6 = vector.load %arg3[%5, %c0, %c0_1] : memref<8x2x1xf32, #tpu.memory_space<vmem>>, vector<4x2x1xf32>
    %c0_2 = arith.constant 0 : index
    %c0_3 = arith.constant 0 : index
    %c0_4 = arith.constant 0 : index
    %7 = vector.load %arg2[%c0_2, %c0_3, %c0_4] : memref<4x2x512xf32, #tpu.memory_space<vmem>>, vector<4x2x512xf32>
    %c0_5 = arith.constant 0 : index
    %c0_6 = arith.constant 0 : index
    %8 = vector.load %arg5[%c0_5, %c0_6] : memref<2x512xf32, #tpu.memory_space<vmem>>, vector<2x512xf32>
    %9 = vector.broadcast %6 : vector<4x2x1xf32> to vector<4x2x512xf32>
    %10 = arith.mulf %7, %9 : vector<4x2x512xf32>
    %cst = arith.constant dense<0.000000e+00> : vector<2x512xf32>
    %11 = vector.multi_reduction <add>, %10, %cst [0] : vector<4x2x512xf32> to vector<2x512xf32>
    %12 = arith.addf %8, %11 : vector<2x512xf32>
    %c0_7 = arith.constant 0 : index
    %c0_8 = arith.constant 0 : index
    %13 = vector.load %arg5[%c0_7, %c0_8] : memref<2x512xf32, #tpu.memory_space<vmem>>, vector<2x512xf32>
    tpu.vector_store %arg5[%c0_7, %c0_8], %12 {strides = array<i32>} : memref<2x512xf32, #tpu.memory_space<vmem>>, vector<2x512xf32>,
    %c1_i32 = arith.constant 1 : i32
    %14 = arith.cmpi eq, %arg1, %c1_i32 : i32
    %15 = arith.extui %14 : i1 to i32
    %c0_i32_9 = arith.constant 0 : i32
    %16 = arith.cmpi ne, %15, %c0_i32_9 : i32
    scf.if %16 {
      %c0_10 = arith.constant 0 : index
      %c0_11 = arith.constant 0 : index
      %17 = vector.load %arg5[%c0_10, %c0_11] : memref<2x512xf32, #tpu.memory_space<vmem>>, vector<2x512xf32>
      %c0_12 = arith.constant 0 : index
      %c0_13 = arith.constant 0 : index
      %18 = vector.load %arg4[%c0_12, %c0_13] : memref<2x512xf32, #tpu.memory_space<vmem>>, vector<2x512xf32>
      tpu.vector_store %arg4[%c0_12, %c0_13], %17 {strides = array<i32>} : memref<2x512xf32, #tpu.memory_space<vmem>>, vector<2x512xf32>,
    } else {
    }
    return
  }
  func.func @transform_0(%arg0: i32, %arg1: i32) -> (i32, i32, i32) {
    %c0_i32 = arith.constant 0 : i32
    %c0_i32_0 = arith.constant 0 : i32
    return %arg1, %arg0, %c0_i32 : i32, i32, i32
  }
  func.func @transform_1(%arg0: i32, %arg1: i32) -> (i32, i32, i32) {
    %c0_i32 = arith.constant 0 : i32
    %c0_i32_0 = arith.constant 0 : i32
    %c0_i32_1 = arith.constant 0 : i32
    return %c0_i32, %arg0, %c0_i32_0 : i32, i32, i32
  }
  func.func @transform_2(%arg0: i32, %arg1: i32) -> (i32, i32) {
    %c0_i32 = arith.constant 0 : i32
    %c0_i32_0 = arith.constant 0 : i32
    return %arg0, %c0_i32 : i32, i32
  }
}

</mosaic_0001>

<bundles_post_ra>
// kernel: tpu_custom_call.1
= control target key start
LH: loop header
LB: loop body
LE: loop exit
PB: predicated region body
PF: predicated region fallthrough
CT: control target
= control target key end

     0   :  { %7 = vsyncpa [#allocation4], 0  ;;  %s777_s0 = inlined_call_operand.hbm [shape: f32[8,2,512], index: 0, kind: input, shape index: {}]   ;;  %s778_s1 = inlined_call_operand.vmem [shape: f32[8,2,1], index: 1, kind: input, shape index: {}]   ;;  %s779_s2 = inlined_call_operand.hbm [shape: f32[2,512], index: 2, kind: output, shape index: {}]  }
   0x1   :  { %9 = vsyncpa [#allocation4 + $0x1], 0 }
   0x2   :  { %10 = vsyncpa [#allocation5], 0  ;;  %s658_s9 = smov 0   ;;  %s660_s10 = smov 0  }
   0x3   :  { %s662_s11 = smov 0   ;;  %s664_s12 = smov 0  }
   0x4   :  { %s666_s13 = smov 0   ;;  %s668_s14 = smov 0  }
   0x5 LB: > { %s433_s15 = sadd.s32 4294967295, %s635_s14   ;;  %s25_s16 = sadd.s32 1, %s631_s13  ;;  %s635_s14 = sphi %s668_s14, %s16_s14   ;;  %s631_s13 = sphi %s666_s13, %s786_s13   ;;  %s627_s12 = sphi %s664_s12, %s785_s12   ;;  %s623_s11 = sphi %s662_s11, %s784_s11   ;;  %s619_s10 = sphi %s660_s10, %s783_s10   ;;  %s615_s9 = sphi %s658_s9, %s782_s9  }
   0x6   : > { %p26_p0 = scmp.ge.s32.totalorder %s25_s16, 2  ;;  %s37_s17 = sadd.s32 1, %s623_s11 }
   0x7   : > { %p44_p1 = scmp.ne.s32.totalorder %s623_s11, %s619_s10  ;;  %p45_p2 = scmp.eq.s32.totalorder %s635_s14, 0 }
   0x8   : > { %s788_s16 = smov (%p26_p0, %s25_s16), 0  ;;  %p50_p4 = scmp.ne.s32.totalorder %s619_s10, %s615_s9 }
   0x9   : > { %p694_p3 = por %p45_p2, %p44_p1  ;;  %s32_s19 = ssub.s32 %s631_s13, %s788_s16 }
   0xa   : > { %p51_p5 = scmp.eq.s32.totalorder %s433_s15, 0  ;;  %p35_p6 = scmp.eq.s32.totalorder %s32_s19, 0 }
   0xb   : > { %p464_p8 = scmp.lt.s32.totalorder %s635_s14, 2  ;;  %s133_s22 = sand.u32 1, %s623_s11  }
   0xc   : > { %p703_p7 = por %p51_p5, %p50_p4  ;;  %s452_s23 = sshll.u32 %s631_s13, 5 }
   0xd   : > { %s709_s21 = scalar_select %p35_p6, %s623_s11, %s37_s17  }
   0xe   : > { %s437_s24 = sshll.u32 %s133_s22, 5  ;;  %s145_s27 = scalar_lea.hbm %s777_s0, %s452_s23 }
   0xf   : > { %s146_s28 = sshll.u32 %s145_s27, 4  ;;  %s137_s29 = scalar_lea.vmem [#allocation3], %s437_s24  ;;  %s147_s28 = int_to_ptr.hbm [resolvable:$true] %s146_s28 }
  0x10   : > { %s148_s30 = sshll.u32 %s137_s29, 4  ;;  %p461_p9 = pnand %p464_p8, %p694_p3  ;;  %s149_s30 = int_to_ptr.vmem [resolvable:$true] %s148_s30 }
  0x11   : > { %p441_p10 = scmp.ge.s32.totalorder %s635_s14, 1  ;;  %p156_p11 = scmp.lt.s32.totalorder %s635_s14, 3 }
  0x12   : > { %s134_s3 = scalar_lea.sflag [#allocation4], %s133_s22  ;;  %s637_s4 = smov 128  }
  0x13   : > { %s638_s5 = smov 8   ;;  %p157_p12 = pnand %p441_p10, %p156_p11 }
  0x14   : > { %463 = dma.hbm_to_vmem [thread:$0]  (!%p461_p9), %s147_s28, 512, %s149_s30, %s134_s3, %s637_s4, %s637_s4, %s638_s5  }
  0x15   : > { %160 = sbr.rel (%p157_p12) target bundleno = 210 (0xd2), region = 28  ;;  %s162_s6 = sand.u32 (!%p157_p12), 1, %s619_s10  }
  0x16   : > { %s442_s7 = sshll.u32 (!%p157_p12), %s162_s6, 5  ;;  %s163_s8 = scalar_lea.sflag (!%p157_p12), [#allocation4], %s162_s6 }
  0x17   : > { %s721_s9 = scalar_lea.vmem (!%p157_p12), [#allocation3], %s442_s7 }
  0x1a   : > { %606 = dma.done.wait (%p703_p7), %s163_s8, 512  }
  0x1b   : > { %608 = vsyncadd (%p703_p7), %s163_s8, 4294966784  ;;  %p443_p13 = scmp.ne.s32.totalorder %s627_s12, 0 }
  0x1d   : > { %195 = sbr.rel (%p443_p13) target bundleno = 36 (0x24), region = 36 }
  0x22   : > { %v639_v0 = vmov 0.0  }
  0x23   : > { %196 = vst [vmem:[#allocation2] sm:$0xff] %v639_v0 }
  0x24 PF: > { %s453_s17 = sshll.u32 %s627_s12, 3  ;;  %v640_v1 = vmov 0   ;;  %v641_v6 = vmov 269488144   ;;  %v204_v9 = vld [vmem:[%s721_s9] sm:$0xff]  ;;  %v206_v15 = vld [vmem:[%s721_s9 + $0x10] sm:$0xff] }
  0x25   : > { %522 = vset.pattern.permute.xlu1 %v640_v1  ;;  %521 = vset.pattern.permute.xlu0 %v640_v1  ;;  %s199_s22 = scalar_lea.vmem %s778_s1, %s453_s17  ;;  %v226_v7 = vunpack.c.l.s4 %v641_v6  ;;  %v205_v16 = vld [vmem:[%s721_s9 + $0x8] sm:$0xff]  ;;  %v207_v27 = vld [vmem:[%s721_s9 + $0x18] sm:$0xff]  ;;  %vm290_vm0 = vcmask 1041408   ;;  %vm327_vm1 = vcmask 1045508   ;;  %vm329_vm2 = vcmask 1043456   ;;  %p446_p0 = scmp.ne.s32.totalorder %s627_s12, 1 }
  0x26   : > { %v202_v2 = vld [vmem:[%s199_s22 + $0x4] sm:$0x3]  ;;  %v200_v3 = vld [vmem:[%s199_s22] sm:$0x3]  ;;  %v203_v4 = vld [vmem:[%s199_s22 + $0x6] sm:$0x3] }
  0x27   : > { %219 = vperm.xlu1 %522, %v202_v2   ;;  %211 = vperm.xlu0 %521, %v200_v3   ;;  %v201_v5 = vld [vmem:[%s199_s22 + $0x2] sm:$0x3]  ;;  %v227_v8 = vunpack.c.0.s8 %v226_v7 }
  0x2f   : > { %223 = vperm.xlu1 %522, %v203_v4   ;;  %215 = vperm.xlu0 %521, %v201_v5  }
  0x99   : > { %v212_v10 = vpop.permute.xlu0 %211  ;;  %v220_v13 = vpop.permute.xlu1 %219 }
  0x9a   : > { %v228_v11 = vperm.slane %v212_v10, %v227_v8  ;;  %v236_v14 = vperm.slane %v220_v13, %v227_v8 }
  0x9c   : > { %v245_v12 = vmul.f32 %v228_v11, %v204_v9  ;;  %v247_v19 = vmul.f32 %v236_v14, %v206_v15 }
  0x9e   : > { %253 = vst [vmem:[#allocation1] ss:$4 sm:$0xff] %v245_v12 }
  0xa1   : > { %v216_v17 = vpop.permute.xlu0 %215  ;;  %v224_v25 = vpop.permute.xlu1 %223 }
  0xa2   : > { %v232_v18 = vperm.slane %v216_v17, %v227_v8  ;;  %v240_v26 = vperm.slane %v224_v25, %v227_v8  ;;  %v208_v8 = vld [vmem:[#allocation2] sm:$0xff] }
  0xa4   : > { %v246_v20 = vmul.f32 %v232_v18, %v205_v16  ;;  %v248_v28 = vmul.f32 %v240_v26, %v207_v27 }
  0xa5   : > { %v254_v21 = vld.sshfl [vmem:[#allocation1] sm:$0xff pattern:$0x73625140]  ;;  %v255_v22 = vld.sshfl [vmem:[#allocation1 + $0x8] sm:$0xff pattern:$0x73625140] }
  0xa6   : > { %v256_v23 = vld.sshfl [vmem:[#allocation1 + $0x10] sm:$0xff pattern:$0x73625140]  ;;  %v257_v24 = vld.sshfl [vmem:[#allocation1 + $0x18] sm:$0xff pattern:$0x73625140] }
  0xa7   : > { %264 = vst [vmem:[#allocation1] ss:$4 sm:$0xff] %v247_v19  ;;  %v298_v33 = vsel %vm290_vm0, %v255_v22, 0.0  ;;  %v305_v40 = vsel %vm290_vm0, %v256_v23, 0.0  ;;  %v312_v41 = vsel %vm290_vm0, %v257_v24, 0.0  ;;  %v291_v47 = vsel %vm290_vm0, %v254_v21, 0.0 }
  0xa8   : > { %259 = vst [vmem:[#allocation1 + $0x20] ss:$4 sm:$0xff] %v246_v20 }
  0xae   : > { %v265_v34 = vld.sshfl [vmem:[#allocation1] sm:$0xff pattern:$0x73625140]  ;;  %v266_v38 = vld.sshfl [vmem:[#allocation1 + $0x8] sm:$0xff pattern:$0x73625140] }
  0xaf   : > { %v260_v29 = vld.sshfl [vmem:[#allocation1 + $0x20] sm:$0xff pattern:$0x73625140]  ;;  %v261_v30 = vld.sshfl [vmem:[#allocation1 + $0x28] sm:$0xff pattern:$0x73625140] }
  0xb0   : > { %v262_v31 = vld.sshfl [vmem:[#allocation1 + $0x30] sm:$0xff pattern:$0x73625140]  ;;  %v263_v32 = vld.sshfl [vmem:[#allocation1 + $0x38] sm:$0xff pattern:$0x73625140] }
  0xb1   : > { %269 = vst [vmem:[#allocation1 + $0x20] ss:$4 sm:$0xff] %v248_v28  ;;  %v299_v35 = vsel %vm290_vm0, %v261_v30, 0.0  ;;  %v306_v36 = vsel %vm290_vm0, %v262_v31, 0.0  ;;  %v313_v37 = vsel %vm290_vm0, %v263_v32, 0.0  ;;  %v292_v43 = vsel %vm290_vm0, %v260_v29, 0.0 }
  0xb2   : > { %v267_v39 = vld.sshfl [vmem:[#allocation1 + $0x10] sm:$0xff pattern:$0x73625140]  ;;  %v268_v42 = vld.sshfl [vmem:[#allocation1 + $0x18] sm:$0xff pattern:$0x73625140]  ;;  %v300_v44 = vadd.f32 %v299_v35, %v298_v33  ;;  %v307_v45 = vadd.f32 %v306_v36, %v305_v40  ;;  %v314_v46 = vadd.f32 %v313_v37, %v312_v41  ;;  %v293_v52 = vadd.f32 %v292_v43, %v291_v47 }
  0xb3   : > { %v294_v48 = vsel %vm290_vm0, %v265_v34, 0.0  ;;  %v301_v49 = vsel %vm290_vm0, %v266_v38, 0.0  ;;  %v308_v50 = vsel %vm290_vm0, %v267_v39, 0.0  ;;  %v315_v51 = vsel %vm290_vm0, %v268_v42, 0.0 }
  0xb4   : > { %v302_v57 = vadd.f32 %v301_v49, %v300_v44  ;;  %v309_v58 = vadd.f32 %v308_v50, %v307_v45  ;;  %v316_v59 = vadd.f32 %v315_v51, %v314_v46  ;;  %v295_v0 = vadd.f32 %v294_v48, %v293_v52 }
  0xb8   : > { %v270_v53 = vld.sshfl [vmem:[#allocation1 + $0x20] sm:$0xff pattern:$0x73625140]  ;;  %v271_v54 = vld.sshfl [vmem:[#allocation1 + $0x28] sm:$0xff pattern:$0x73625140] }
  0xb9   : > { %v272_v55 = vld.sshfl [vmem:[#allocation1 + $0x30] sm:$0xff pattern:$0x73625140]  ;;  %v273_v56 = vld.sshfl [vmem:[#allocation1 + $0x38] sm:$0xff pattern:$0x73625140] }
  0xba   : > { %v296_v60 = vsel %vm290_vm0, %v270_v53, 0.0  ;;  %v303_v61 = vsel %vm290_vm0, %v271_v54, 0.0  ;;  %v310_v62 = vsel %vm290_vm0, %v272_v55, 0.0  ;;  %v317_v63 = vsel %vm290_vm0, %v273_v56, 0.0 }
  0xbb   : > { %v304_v1 = vadd.f32 %v303_v61, %v302_v57  ;;  %v311_v2 = vadd.f32 %v310_v62, %v309_v58  ;;  %v318_v3 = vadd.f32 %v317_v63, %v316_v59  ;;  %v297_v4 = vadd.f32 %v296_v60, %v295_v0 }
  0xbd   : > { %v323_v5 = vrot.slane %v304_v1, 6  ;;  %v324_v6 = vrot.slane %v311_v2, 4  ;;  %v325_v7 = vrot.slane %v318_v3, 2 }
  0xbf   : > { %v326_v9 = vsel %vm290_vm0, %v297_v4, %v323_v5  ;;  %v328_v10 = vsel %vm327_vm1, %v324_v6, %v325_v7  ;;  %337 = sbr.rel (%p446_p0) target bundleno = 204 (0xcc), region = 40 }
  0xc0   : > { %v330_v11 = vsel %vm329_vm2, %v326_v9, %v328_v10 }
  0xc1   : > { %v332_v12 = vadd.f32 %v330_v11, %v208_v8 }
  0xc3   : > { %333 = vst [vmem:[#allocation2] sm:$0xff] %v332_v12 }
  0xca   : > { %v338_v13 = vld [vmem:[#allocation2] sm:$0xff] }
  0xcb   : > { %339 = vst [vmem:[#allocation6] sm:$0xff] %v338_v13 }
  0xcc PF: > { %p465_p1 = scmp.eq.s32.totalorder %s433_s15, 1  ;;  %s351_s24 = sshll.u32 %s779_s2, 4  ;;  %s352_s24 = int_to_ptr.hbm [resolvable:$true] %s351_s24 }
  0xcd   : > { %s642_s25 = smov [#allocation6]  }
  0xce   : > { %s349_s26 = sshll.u32 %s642_s25, 4  ;;  %s350_s26 = int_to_ptr.vmem [resolvable:$true] %s349_s26 }
  0xcf   : > { %457 = dma.vmem_to_hbm [thread:$0]  (%p465_p1), %s350_s26, 128, %s352_s24, [#allocation5]  }
  0xd0   : > { %610 = dma.done.wait (%p465_p1), [#allocation5], 128  }
  0xd1   : > { %612 = vsyncadd (%p465_p1), [#allocation5], 4294967168 }
  0xd2 PF: > { %s16_s14 = sadd.s32 1, %s635_s14   ;;  %s782_s9 = smov %s619_s10 }
  0xd3   : > { %p13_p2 = scmp.ge.s32.totalorder %s16_s14, 4   ;;  %s783_s10 = smov %s623_s11 }
  0xd4   : > { %s784_s11 = smov %s709_s21  ;;  %s785_s12 = smov %s631_s13 }
  0xd5   : > { %s786_s13 = smov %s788_s16  ;;  %15 = sbr.rel (!%p13_p2) target bundleno = 5 (0x5), region = 79 }
  0xda   :  { %365 = vsyncpa [#allocation4], 1 }
  0xdb   :  { %367 = vsyncpa [#allocation4 + $0x1], 1 }
  0xdc   :  { %368 = vsyncpa [#allocation5], 1 }
  0xdd   :  { %370 = vsyncpa [#allocation5 + $0x1], 1 }

</bundles_post_ra>
